<compile_context>
chip_gen: v5e
topology: v5e:2x2
jax: 0.10.0
libtpu: 0.0.40
codegen_flags: <defaults>
</compile_context>

<pallas_src>
import math
from functools import reduce
import operator

import jax
import jax.numpy as jnp
from jax.experimental import pallas as pl
from jax.experimental.pallas import tpu as pltpu

_BN_EPS = 1e-5
_LANE = 128


def _round_up(n, m):
    return ((n + m - 1) // m) * m


# ---------------------------------------------------------------------------
# Fused kernel
# ---------------------------------------------------------------------------
def _make_fused_mlp_kernel(num_layers):
    """Build the fused kernel body for `num_layers` hidden layers.

    Ref shapes (feature dims padded: Fin_p mult of 128, P common padded width):
      x_ref:      [1, B, Fin_p] f32   (one independent BN microbatch)
      w1_ref:     [Fin_p, P]    bf16  (hidden layer 1 weight, [in, out])
      wstack_ref: [L, P, P]     bf16  (hidden layers 2..L, then the fc head)
      gb_ref:     [L, 2, P]     f32   (gamma at [:,0,:], beta at [:,1,:])
      o_ref:      [1, B, P]     f32   (padded, lane-dense logits)
    """

    def kernel(x_ref, w1_ref, wstack_ref, gb_ref, o_ref):
        # bf16 MXU operands, f32 accumulate / epilogue.
        x = x_ref[0].astype(jnp.bfloat16)            # [B, Fin_p]
        gb = gb_ref[...]                             # [L, 2, P] f32

        for i in range(num_layers):
            w = w1_ref[...] if i == 0 else wstack_ref[i - 1]
            # Linear bias intentionally omitted: with track_running_stats=False
            # BatchNorm, the batch-mean subtraction cancels it exactly.
            y = jnp.dot(x, w, preferred_element_type=jnp.float32)   # [B, P] f32

            # BatchNorm1d with batch statistics (biased variance).
            mean = jnp.mean(y, axis=0, keepdims=True)
            centered = y - mean
            var = jnp.mean(centered * centered, axis=0, keepdims=True)
            # gamma folded into the per-feature scale row; padded lanes have
            # gamma = beta = 0 so they stay identically 0 through BN/ReLU.
            scale = gb[i, 0:1, :] * jax.lax.rsqrt(var + _BN_EPS)
            y = jnp.maximum(centered * scale + gb[i, 1:2, :], 0.0)  # ReLU
            # Dropout -> identity in eval mode.
            x = y.astype(jnp.bfloat16)

        # Head: no-bias Linear; lane-dense padded store.
        head = jnp.dot(x, wstack_ref[num_layers - 1],
                       preferred_element_type=jnp.float32)
        o_ref[0] = head.astype(o_ref.dtype)

    return kernel


def mlp_fused_forward(x_stacked, w1, wstack, gb, num_layers):
    """One pallas_call over N independent BN microbatches.

    x_stacked: [N, B, Fin_p] f32. Returns padded logits [N, B, P] f32.
    Each grid step processes one full BN batch (stats never split across steps).
    """
    N, B, fin_p = x_stacked.shape
    L, _, P = gb.shape

    flops = 2 * N * B * (fin_p * P + (num_layers - 1) * P * P + P * P)
    transcendentals = N * num_layers * P            # rsqrt per BN feature
    bytes_accessed = (x_stacked.size * 4 + w1.size * 2 + wstack.size * 2
                      + gb.size * 4 + N * B * P * 4)

    return pl.pallas_call(
        _make_fused_mlp_kernel(num_layers),
        out_shape=jax.ShapeDtypeStruct((N, B, P), jnp.float32),
        grid=(N,),
        in_specs=[
            # Activations: tiled along the microbatch grid axis.
            pl.BlockSpec((1, B, fin_p), lambda n: (n, 0, 0)),
            # Weights / BN params: constant block index -> VMEM-resident.
            pl.BlockSpec((fin_p, P), lambda n: (0, 0)),
            pl.BlockSpec((L, P, P), lambda n: (0, 0, 0)),
            pl.BlockSpec((L, 2, P), lambda n: (0, 0, 0)),
        ],
        out_specs=pl.BlockSpec((1, B, P), lambda n: (n, 0, 0)),
        compiler_params=pltpu.CompilerParams(
            dimension_semantics=("parallel",)),      # engage both TCs on v7x
        cost_estimate=pl.CostEstimate(
            flops=flops, transcendentals=transcendentals,
            bytes_accessed=bytes_accessed),
    )(x_stacked, w1, wstack, gb)


# ---------------------------------------------------------------------------
# MLP module (parameters built deterministically in-script)
# ---------------------------------------------------------------------------
class MLPPallas:
    def __init__(self, dimension, num_classes, hidden_size, drop_rate=0.0,
                 robust=False, key=None):
        if not isinstance(hidden_size, list):
            hidden_size = [hidden_size]
        self.num_layers = len(hidden_size)
        self.num_features = reduce(operator.mul, dimension)
        self.num_classes = num_classes
        self.image = isinstance(dimension, list)
        self.robust = robust
        self.drop_rate = drop_rate  # eval mode -> dropout is identity

        if key is None:
            key = jax.random.PRNGKey(0)

        self.fin_p = _round_up(self.num_features, _LANE)
        # Common padded width for every hidden layer and the head output so all
        # [P, P] weights (hidden 2..L + fc) can be stacked into ONE input.
        self.p = max([_round_up(h, _LANE) for h in hidden_size]
                     + [_round_up(num_classes, _LANE)])

        # Unpadded f32 params (reference semantics, incl. Linear bias) and
        # padded bf16/f32 kernel params.
        self.ref_params = []          # (w[in,out], b[1,out], gamma, beta) f32
        stacked_weights = []          # hidden layers 2..L, then fc (all [P,P])
        stacked_gb = []               # per layer [2, P]

        in_features = self.num_features
        in_pad = self.fin_p
        for li, h in enumerate(hidden_size):
            key, kw, kb = jax.random.split(key, 3)
            bound = 1.0 / math.sqrt(in_features)
            # PyTorch Linear stores weight as [out,in]; keep [in,out] so the
            # kernel computes x @ w directly.
            w = jax.random.uniform(kw, (in_features, h), jnp.float32,
                                   minval=-bound, maxval=bound)
            b = jax.random.uniform(kb, (1, h), jnp.float32,
                                   minval=-bound, maxval=bound)
            gamma = jnp.ones((1, h), jnp.float32)
            beta = jnp.zeros((1, h), jnp.float32)
            self.ref_params.append((w, b, gamma, beta))

            w_pad = jnp.zeros((in_pad, self.p), jnp.float32)
            w_pad = w_pad.at[:in_features, :h].set(w).astype(jnp.bfloat16)
            if li == 0:
                self.w1_padded = w_pad
            else:
                stacked_weights.append(w_pad)
            gb_pad = jnp.zeros((2, self.p), jnp.float32)
            gb_pad = gb_pad.at[0, :h].set(gamma[0]).at[1, :h].set(beta[0])
            stacked_gb.append(gb_pad)

            in_features, in_pad = h, self.p

        key, kfc = jax.random.split(key)
        bound = 1.0 / math.sqrt(in_features)
        self.ref_fc_w = jax.random.uniform(kfc, (in_features, num_classes),
                                           jnp.float32, minval=-bound,
                                           maxval=bound)
        fc_pad = jnp.zeros((self.p, self.p), jnp.float32)
        fc_pad = fc_pad.at[:in_features, :num_classes].set(self.ref_fc_w)
        stacked_weights.append(fc_pad.astype(jnp.bfloat16))

        # Coalesced kernel parameters (3 arrays total).
        self.wstack = jnp.stack(stacked_weights, axis=0)   # [L, P, P] bf16
        self.gb = jnp.stack(stacked_gb, axis=0)            # [L, 2, P] f32

        if self.robust:
            key, kn = jax.random.split(key)
            self.noise = jax.random.normal(kn, (self.num_features,),
                                           jnp.float32) * 0.001

        # Single-dispatch jitted forwards (pad + kernel + slice fused under jit).
        self._jit_forward = jax.jit(self._forward_impl)
        self._jit_forward_mb = jax.jit(self._forward_microbatched_impl)

    # -- input prep (mirrors torch forward: view -> +noise) ------------------
    def _prep_features(self, x, lead_shape):
        if self.image:
            x = x.reshape(*lead_shape, self.num_features)
        x = x.astype(jnp.float32)
        if self.robust:
            x = x + self.noise
        if self.fin_p != self.num_features:
            pad = [(0, 0)] * (x.ndim - 1) + [(0, self.fin_p - self.num_features)]
            x = jnp.pad(x, pad)
        return x

    # -- forwards -------------------------------------------------------------
    def _forward_impl(self, x):
        """Single BN batch; returns [B, num_classes] (module semantics)."""
        xf = self._prep_features(x, (-1,))                    # [B, Fin_p]
        out_p = mlp_fused_forward(xf[None], self.w1_padded, self.wstack,
                                  self.gb, self.num_layers)   # [1, B, P]
        return out_p[0, :, :self.num_classes]

    def _forward_microbatched_impl(self, x_stack):
        """N independent BN batches in one pallas_call; returns padded [N,B,P].

        Keep the padded lane-dense logits; slice [..., :num_classes] only at
        the final consumer (perf review: avoids an extra device op here)."""
        xf = self._prep_features(x_stack, (x_stack.shape[0], -1))
        return mlp_fused_forward(xf, self.w1_padded, self.wstack,
                                 self.gb, self.num_layers)

    def __call__(self, x):
        return self._jit_forward(x)

    def forward_microbatched(self, x_stack):
        return self._jit_forward_mb(x_stack)

    # -- pure-JAX f32 reference (with Linear bias, eval-mode dropout) ---------
    def reference(self, x):
        if self.image:
            x = x.reshape(-1, self.num_features)
        x = x.astype(jnp.float32)
        if self.robust:
            x = x + self.noise
        for (w, b, gamma, beta) in self.ref_params:
            y = x @ w + b
            mean = jnp.mean(y, axis=0, keepdims=True)
            var = jnp.mean((y - mean) ** 2, axis=0, keepdims=True)
            y = (y - mean) * jax.lax.rsqrt(var + _BN_EPS) * gamma + beta
            x = jnp.maximum(y, 0.0)
        return x @ self.ref_fc_w


# ---------------------------------------------------------------------------
if __name__ == "__main__":
    key = jax.random.PRNGKey(0)
    key, kx, kmb = jax.random.split(key, 3)

    # dataset_config.dimension = [4, 16, 16] (NCHW image), num_classes = 10
    dimension = [4, 16, 16]
    num_classes = 10
    batch = 8
    hidden_size = [32, 32]

    model = MLPPallas(dimension=dimension, num_classes=num_classes,
                      hidden_size=hidden_size, drop_rate=0.1,
                      robust=False, key=key)

    # --- single BN batch (exact module semantics) ---------------------------
    x = jax.random.normal(kx, (batch, *dimension), jnp.float32)
    out = jax.block_until_ready(model(x))
    assert out.shape == (batch, num_classes), out.shape
    assert bool(jnp.all(jnp.isfinite(out)))

    ref = model.reference(x)
    max_err = float(jnp.max(jnp.abs(out - ref)))
    # Tightened vs previous 1e-1 (bf16 MXU operands, f32 accumulation).
    assert bool(jnp.allclose(out, ref, rtol=5e-2, atol=5e-2)), max_err

    # --- microbatched: 4 independent BN batches in ONE pallas_call (grid) ---
    n_micro = 4
    x_mb = jax.random.normal(kmb, (n_micro, batch, *dimension), jnp.float32)
    out_mb_padded = jax.block_until_ready(model.forward_microbatched(x_mb))
    assert out_mb_padded.shape == (n_micro, batch, model.p)
    out_mb = out_mb_padded[..., :num_classes]   # slice once, at the consumer
    for i in range(n_micro):
        ref_i = model.reference(x_mb[i])
        assert bool(jnp.allclose(out_mb[i], ref_i, rtol=5e-2, atol=5e-2)), (
            i, float(jnp.max(jnp.abs(out_mb[i] - ref_i))))

    print("KERNEL_OK")
</pallas_src>

<mosaic_0001>
module attributes {stable_mosaic.version = 11 : i64} {
  func.func @kernel(%arg0: i32, %arg1: memref<1x8x1024xf32, #tpu.memory_space<vmem>>, %arg2: memref<1024x128xbf16, #tpu.memory_space<vmem>>, %arg3: memref<2x128x128xbf16, #tpu.memory_space<vmem>>, %arg4: memref<2x2x128xf32, #tpu.memory_space<vmem>>, %arg5: memref<1x8x128xf32, #tpu.memory_space<vmem>>) attributes {dimension_semantics = [#tpu.dimension_semantics<parallel>], iteration_bounds = array<i64: 1>, scalar_prefetch = 0 : i64, scratch_operands = 0 : i64, tpu.core_type = #tpu.core_type<tc>, window_params = [{transform_indices = @transform_0, window_bounds = array<i64: 1, 8, 1024>}, {pipeline_mode = #tpu.pipeline_mode<synchronous>, transform_indices = @transform_1, window_bounds = array<i64: 1024, 128>}, {pipeline_mode = #tpu.pipeline_mode<synchronous>, transform_indices = @transform_2, window_bounds = array<i64: 2, 128, 128>}, {pipeline_mode = #tpu.pipeline_mode<synchronous>, transform_indices = @transform_3, window_bounds = array<i64: 2, 2, 128>}, {transform_indices = @transform_4, window_bounds = array<i64: 1, 8, 128>}]} {
    %c0 = arith.constant 0 : index
    %c0_0 = arith.constant 0 : index
    %c0_1 = arith.constant 0 : index
    %0 = vector.load %arg1[%c0, %c0_0, %c0_1] : memref<1x8x1024xf32, #tpu.memory_space<vmem>>, vector<1x8x1024xf32>
    %1 = vector.shape_cast %0 : vector<1x8x1024xf32> to vector<8x1024xf32>
    %2 = arith.truncf %1 : vector<8x1024xf32> to vector<8x1024xbf16>
    %c0_2 = arith.constant 0 : index
    %c0_3 = arith.constant 0 : index
    %c0_4 = arith.constant 0 : index
    %3 = vector.load %arg4[%c0_2, %c0_3, %c0_4] : memref<2x2x128xf32, #tpu.memory_space<vmem>>, vector<2x2x128xf32>
    %c0_5 = arith.constant 0 : index
    %c0_6 = arith.constant 0 : index
    %4 = vector.load %arg2[%c0_5, %c0_6] : memref<1024x128xbf16, #tpu.memory_space<vmem>>, vector<1024x128xbf16>
    %cst = arith.constant dense<0.000000e+00> : vector<8x128xf32>
    %5 = tpu.matmul %2, %4, %cst {dimension_numbers = #tpu.dot_dimension_numbers<[1], [0], [0], [1], [0, 0, 1, 1], [], []>} : vector<8x1024xbf16>, vector<1024x128xbf16>, vector<8x128xf32> -> vector<8x128xf32>
    %cst_7 = arith.constant dense<0.000000e+00> : vector<128xf32>
    %6 = vector.multi_reduction <add>, %5, %cst_7 [0] : vector<8x128xf32> to vector<128xf32>
    %7 = vector.shape_cast %6 : vector<128xf32> to vector<1x128xf32>
    %cst_8 = arith.constant 8.000000e+00 : f32
    %8 = vector.broadcast %cst_8 : f32 to vector<1x128xf32>
    %9 = arith.divf %7, %8 : vector<1x128xf32>
    %10 = vector.broadcast %9 : vector<1x128xf32> to vector<8x128xf32>
    %11 = arith.subf %5, %10 : vector<8x128xf32>
    %12 = arith.mulf %11, %11 : vector<8x128xf32>
    %cst_9 = arith.constant dense<0.000000e+00> : vector<128xf32>
    %13 = vector.multi_reduction <add>, %12, %cst_9 [0] : vector<8x128xf32> to vector<128xf32>
    %14 = vector.shape_cast %13 : vector<128xf32> to vector<1x128xf32>
    %cst_10 = arith.constant 8.000000e+00 : f32
    %15 = vector.broadcast %cst_10 : f32 to vector<1x128xf32>
    %16 = arith.divf %14, %15 : vector<1x128xf32>
    %17 = vector.extract_strided_slice %3 {offsets = [0, 0, 0], sizes = [1, 1, 128], strides = [1, 1, 1]} : vector<2x2x128xf32> to vector<1x1x128xf32>
    %18 = vector.shape_cast %17 : vector<1x1x128xf32> to vector<1x128xf32>
    %cst_11 = arith.constant 9.99999974E-6 : f32
    %19 = vector.broadcast %cst_11 : f32 to vector<1x128xf32>
    %20 = arith.addf %16, %19 : vector<1x128xf32>
    %21 = math.rsqrt %20 : vector<1x128xf32>
    %22 = arith.mulf %18, %21 : vector<1x128xf32>
    %23 = vector.broadcast %22 : vector<1x128xf32> to vector<8x128xf32>
    %24 = arith.mulf %11, %23 : vector<8x128xf32>
    %25 = vector.extract_strided_slice %3 {offsets = [0, 1, 0], sizes = [1, 1, 128], strides = [1, 1, 1]} : vector<2x2x128xf32> to vector<1x1x128xf32>
    %26 = vector.shape_cast %25 : vector<1x1x128xf32> to vector<1x128xf32>
    %27 = vector.broadcast %26 : vector<1x128xf32> to vector<8x128xf32>
    %28 = arith.addf %24, %27 : vector<8x128xf32>
    %cst_12 = arith.constant 0.000000e+00 : f32
    %29 = vector.broadcast %cst_12 : f32 to vector<8x128xf32>
    %30 = arith.maximumf %28, %29 : vector<8x128xf32>
    %31 = arith.truncf %30 : vector<8x128xf32> to vector<8x128xbf16>
    %c0_13 = arith.constant 0 : index
    %c0_14 = arith.constant 0 : index
    %c0_15 = arith.constant 0 : index
    %32 = vector.load %arg3[%c0_13, %c0_14, %c0_15] : memref<2x128x128xbf16, #tpu.memory_space<vmem>>, vector<1x128x128xbf16>
    %33 = vector.shape_cast %32 : vector<1x128x128xbf16> to vector<128x128xbf16>
    %cst_16 = arith.constant dense<0.000000e+00> : vector<8x128xf32>
    %34 = tpu.matmul %31, %33, %cst_16 {dimension_numbers = #tpu.dot_dimension_numbers<[1], [0], [0], [1], [0, 0, 1, 1], [], []>} : vector<8x128xbf16>, vector<128x128xbf16>, vector<8x128xf32> -> vector<8x128xf32>
    %cst_17 = arith.constant dense<0.000000e+00> : vector<128xf32>
    %35 = vector.multi_reduction <add>, %34, %cst_17 [0] : vector<8x128xf32> to vector<128xf32>
    %36 = vector.shape_cast %35 : vector<128xf32> to vector<1x128xf32>
    %cst_18 = arith.constant 8.000000e+00 : f32
    %37 = vector.broadcast %cst_18 : f32 to vector<1x128xf32>
    %38 = arith.divf %36, %37 : vector<1x128xf32>
    %39 = vector.broadcast %38 : vector<1x128xf32> to vector<8x128xf32>
    %40 = arith.subf %34, %39 : vector<8x128xf32>
    %41 = arith.mulf %40, %40 : vector<8x128xf32>
    %cst_19 = arith.constant dense<0.000000e+00> : vector<128xf32>
    %42 = vector.multi_reduction <add>, %41, %cst_19 [0] : vector<8x128xf32> to vector<128xf32>
    %43 = vector.shape_cast %42 : vector<128xf32> to vector<1x128xf32>
    %cst_20 = arith.constant 8.000000e+00 : f32
    %44 = vector.broadcast %cst_20 : f32 to vector<1x128xf32>
    %45 = arith.divf %43, %44 : vector<1x128xf32>
    %46 = vector.extract_strided_slice %3 {offsets = [1, 0, 0], sizes = [1, 1, 128], strides = [1, 1, 1]} : vector<2x2x128xf32> to vector<1x1x128xf32>
    %47 = vector.shape_cast %46 : vector<1x1x128xf32> to vector<1x128xf32>
    %cst_21 = arith.constant 9.99999974E-6 : f32
    %48 = vector.broadcast %cst_21 : f32 to vector<1x128xf32>
    %49 = arith.addf %45, %48 : vector<1x128xf32>
    %50 = math.rsqrt %49 : vector<1x128xf32>
    %51 = arith.mulf %47, %50 : vector<1x128xf32>
    %52 = vector.broadcast %51 : vector<1x128xf32> to vector<8x128xf32>
    %53 = arith.mulf %40, %52 : vector<8x128xf32>
    %54 = vector.extract_strided_slice %3 {offsets = [1, 1, 0], sizes = [1, 1, 128], strides = [1, 1, 1]} : vector<2x2x128xf32> to vector<1x1x128xf32>
    %55 = vector.shape_cast %54 : vector<1x1x128xf32> to vector<1x128xf32>
    %56 = vector.broadcast %55 : vector<1x128xf32> to vector<8x128xf32>
    %57 = arith.addf %53, %56 : vector<8x128xf32>
    %cst_22 = arith.constant 0.000000e+00 : f32
    %58 = vector.broadcast %cst_22 : f32 to vector<8x128xf32>
    %59 = arith.maximumf %57, %58 : vector<8x128xf32>
    %60 = arith.truncf %59 : vector<8x128xf32> to vector<8x128xbf16>
    %c1 = arith.constant 1 : index
    %c0_23 = arith.constant 0 : index
    %c0_24 = arith.constant 0 : index
    %61 = vector.load %arg3[%c1, %c0_23, %c0_24] : memref<2x128x128xbf16, #tpu.memory_space<vmem>>, vector<1x128x128xbf16>
    %62 = vector.shape_cast %61 : vector<1x128x128xbf16> to vector<128x128xbf16>
    %cst_25 = arith.constant dense<0.000000e+00> : vector<8x128xf32>
    %63 = tpu.matmul %60, %62, %cst_25 {dimension_numbers = #tpu.dot_dimension_numbers<[1], [0], [0], [1], [0, 0, 1, 1], [], []>} : vector<8x128xbf16>, vector<128x128xbf16>, vector<8x128xf32> -> vector<8x128xf32>
    %c0_26 = arith.constant 0 : index
    %c0_27 = arith.constant 0 : index
    %c0_28 = arith.constant 0 : index
    %64 = vector.load %arg5[%c0_26, %c0_27, %c0_28] : memref<1x8x128xf32, #tpu.memory_space<vmem>>, vector<1x8x128xf32>
    %65 = vector.shape_cast %64 : vector<1x8x128xf32> to vector<8x128xf32>
    %66 = vector.shape_cast %63 : vector<8x128xf32> to vector<1x8x128xf32>
    tpu.vector_store %arg5[%c0_26, %c0_27, %c0_28], %66 {strides = array<i32>} : memref<1x8x128xf32, #tpu.memory_space<vmem>>, vector<1x8x128xf32>,
    return
  }
  func.func @transform_0(%arg0: i32) -> (i32, i32, i32) {
    %c0_i32 = arith.constant 0 : i32
    %c0_i32_0 = arith.constant 0 : i32
    %c0_i32_1 = arith.constant 0 : i32
    return %arg0, %c0_i32, %c0_i32_0 : i32, i32, i32
  }
  func.func @transform_1(%arg0: i32) -> (i32, i32) {
    %c0_i32 = arith.constant 0 : i32
    %c0_i32_0 = arith.constant 0 : i32
    %c0_i32_1 = arith.constant 0 : i32
    return %c0_i32, %c0_i32_0 : i32, i32
  }
  func.func @transform_2(%arg0: i32) -> (i32, i32, i32) {
    %c0_i32 = arith.constant 0 : i32
    %c0_i32_0 = arith.constant 0 : i32
    %c0_i32_1 = arith.constant 0 : i32
    %c0_i32_2 = arith.constant 0 : i32
    return %c0_i32, %c0_i32_0, %c0_i32_1 : i32, i32, i32
  }
  func.func @transform_3(%arg0: i32) -> (i32, i32, i32) {
    %c0_i32 = arith.constant 0 : i32
    %c0_i32_0 = arith.constant 0 : i32
    %c0_i32_1 = arith.constant 0 : i32
    %c0_i32_2 = arith.constant 0 : i32
    return %c0_i32, %c0_i32_0, %c0_i32_1 : i32, i32, i32
  }
  func.func @transform_4(%arg0: i32) -> (i32, i32, i32) {
    %c0_i32 = arith.constant 0 : i32
    %c0_i32_0 = arith.constant 0 : i32
    %c0_i32_1 = arith.constant 0 : i32
    return %arg0, %c0_i32, %c0_i32_0 : i32, i32, i32
  }
}

</mosaic_0001>

<bundles_post_ra>
// kernel: _forward_impl.1
= control target key start
LH: loop header
LB: loop body
LE: loop exit
PB: predicated region body
PF: predicated region fallthrough
CT: control target
= control target key end

     0   :  { %9 = vsyncpa [#allocation3], 0  ;;  %s1339_s18 = smov [#allocation2]   ;;  %s1340_s20 = smov 64   ;;  %s1602_s0 = inlined_call_operand.vmem [shape: f32[1,8,1024], index: 0, kind: input, shape index: {}]   ;;  %s1603_s1 = inlined_call_operand.vmem [shape: bf16[1024,128], index: 1, kind: input, shape index: {}]   ;;  %s1604_s2 = inlined_call_operand.hbm [shape: bf16[2,128,128], index: 2, kind: input, shape index: {}]   ;;  %s1605_s3 = inlined_call_operand.vmem [shape: f32[2,2,128], index: 3, kind: input, shape index: {}]   ;;  %s1606_s4 = inlined_call_operand.vmem [shape: f32[1,8,128], index: 4, kind: output, shape index: {}]  }
   0x1   :  { %s18_s17 = sshll.u32 %s1604_s2, 4  ;;  %s20_s19 = sshll.u32 %s1339_s18, 4  ;;  %s19_s17 = int_to_ptr.hbm [resolvable:$true] %s18_s17  ;;  %s21_s19 = int_to_ptr.vmem [resolvable:$true] %s20_s19 }
   0x2   :  { %s1341_s21 = smov 4  }
   0x3   :  { %26 = dma.hbm_to_vmem [thread:$0]  %s19_s17, 2048, %s21_s19, [#allocation3], %s1340_s20, %s1340_s20, %s1341_s21  }
   0x4   :  { %1337 = dma.done.wait [#allocation3], 2048  }
   0x5   :  { %1338 = vsyncadd [#allocation3], 4294965248  ;;  %v1230_v0 = vld [vmem:[%s1603_s1 + $0x38] sm:$0xff]  ;;  %v1229_v4 = vld [vmem:[%s1603_s1 + $0x30] sm:$0xff] }
   0x6   :  { %v1238_v1 = vld [vmem:[%s1603_s1 + $0x78] sm:$0xff]  ;;  %563 = vmatpush.bf16.msra.mxu0 %v1230_v0  ;;  %v1237_v5 = vld [vmem:[%s1603_s1 + $0x70] sm:$0xff]  ;;  %v1228_v8 = vld [vmem:[%s1603_s1 + $0x28] sm:$0xff] }
   0x7   :  { %v1246_v2 = vld [vmem:[%s1603_s1 + $0xb8] sm:$0xff]  ;;  %576 = vmatpush.bf16.msra.mxu1 %v1238_v1  ;;  %v1245_v6 = vld [vmem:[%s1603_s1 + $0xb0] sm:$0xff]  ;;  %v1236_v9 = vld [vmem:[%s1603_s1 + $0x68] sm:$0xff] }
   0x8   :  { %v1254_v3 = vld [vmem:[%s1603_s1 + $0xf8] sm:$0xff]  ;;  %589 = vmatpush.bf16.msra.mxu2 %v1246_v2  ;;  %v1253_v7 = vld [vmem:[%s1603_s1 + $0xf0] sm:$0xff]  ;;  %v1244_v10 = vld [vmem:[%s1603_s1 + $0xa8] sm:$0xff] }
   0x9   :  { %602 = vmatpush.bf16.msra.mxu3 %v1254_v3  ;;  %v1252_v11 = vld [vmem:[%s1603_s1 + $0xe8] sm:$0xff]  ;;  %v1227_v12 = vld [vmem:[%s1603_s1 + $0x20] sm:$0xff]  ;;  %v1226_v16 = vld [vmem:[%s1603_s1 + $0x18] sm:$0xff] }
   0xa   :  { %564 = vmatpush.bf16.msra.mxu0 %v1229_v4  ;;  %v1235_v13 = vld [vmem:[%s1603_s1 + $0x60] sm:$0xff]  ;;  %v1234_v17 = vld [vmem:[%s1603_s1 + $0x58] sm:$0xff]  ;;  %v1225_v20 = vld [vmem:[%s1603_s1 + $0x10] sm:$0xff] }
   0xb   :  { %577 = vmatpush.bf16.msra.mxu1 %v1237_v5  ;;  %v1243_v14 = vld [vmem:[%s1603_s1 + $0xa0] sm:$0xff]  ;;  %v1242_v18 = vld [vmem:[%s1603_s1 + $0x98] sm:$0xff]  ;;  %v1233_v21 = vld [vmem:[%s1603_s1 + $0x50] sm:$0xff] }
   0xc   :  { %590 = vmatpush.bf16.msra.mxu2 %v1245_v6  ;;  %v1251_v15 = vld [vmem:[%s1603_s1 + $0xe0] sm:$0xff]  ;;  %v1250_v19 = vld [vmem:[%s1603_s1 + $0xd8] sm:$0xff]  ;;  %v1241_v22 = vld [vmem:[%s1603_s1 + $0x90] sm:$0xff] }
   0xd   :  { %603 = vmatpush.bf16.msra.mxu3 %v1253_v7  ;;  %v1249_v23 = vld [vmem:[%s1603_s1 + $0xd0] sm:$0xff]  ;;  %v1224_v24 = vld [vmem:[%s1603_s1 + $0x8] sm:$0xff]  ;;  %v1223_v28 = vld [vmem:[%s1603_s1] sm:$0xff] }
   0xe   :  { %565 = vmatpush.bf16.msra.mxu0 %v1228_v8  ;;  %v1232_v25 = vld [vmem:[%s1603_s1 + $0x48] sm:$0xff]  ;;  %v1231_v29 = vld [vmem:[%s1603_s1 + $0x40] sm:$0xff]  ;;  %v1262_v32 = vld [vmem:[%s1603_s1 + $0x138] sm:$0xff] }
   0xf   :  { %578 = vmatpush.bf16.msra.mxu1 %v1236_v9  ;;  %v1240_v26 = vld [vmem:[%s1603_s1 + $0x88] sm:$0xff]  ;;  %v1239_v30 = vld [vmem:[%s1603_s1 + $0x80] sm:$0xff]  ;;  %v35_v33 = vld [vmem:[%s1602_s0 + $0x10] sm:$0xff] }
  0x10   :  { %591 = vmatpush.bf16.msra.mxu2 %v1244_v10  ;;  %v1248_v27 = vld [vmem:[%s1603_s1 + $0xc8] sm:$0xff]  ;;  %v1247_v31 = vld [vmem:[%s1603_s1 + $0xc0] sm:$0xff]  ;;  %v1270_v35 = vld [vmem:[%s1603_s1 + $0x178] sm:$0xff]  ;;  %v43_v40 = vpack.c.bf16 %v35_v33, %v35_v33 }
  0x11   :  { %604 = vmatpush.bf16.msra.mxu3 %v1252_v11  ;;  %v33_v34 = vld [vmem:[%s1602_s0] sm:$0xff]  ;;  %v36_v36 = vld [vmem:[%s1602_s0 + $0x18] sm:$0xff]  ;;  %v34_v37 = vld [vmem:[%s1602_s0 + $0x8] sm:$0xff] }
  0x12   :  { %566 = vmatpush.bf16.msra.mxu0 %v1227_v12  ;;  %v1278_v38 = vld [vmem:[%s1603_s1 + $0x1b8] sm:$0xff]  ;;  %v41_v41 = vpack.c.bf16 %v33_v34, %v33_v34  ;;  %v44_v42 = vpack.c.bf16 %v36_v36, %v36_v36  ;;  %v42_v43 = vpack.c.bf16 %v34_v37, %v34_v37  ;;  %v1261_v44 = vld [vmem:[%s1603_s1 + $0x130] sm:$0xff]  ;;  %v1260_v48 = vld [vmem:[%s1603_s1 + $0x128] sm:$0xff] }
  0x13   :  { %579 = vmatpush.bf16.msra.mxu1 %v1235_v13  ;;  %v1286_v39 = vld [vmem:[%s1603_s1 + $0x1f8] sm:$0xff]  ;;  %v1269_v45 = vld [vmem:[%s1603_s1 + $0x170] sm:$0xff]  ;;  %v1268_v49 = vld [vmem:[%s1603_s1 + $0x168] sm:$0xff] }
  0x14   :  { %592 = vmatpush.bf16.msra.mxu2 %v1243_v14  ;;  %v1277_v46 = vld [vmem:[%s1603_s1 + $0x1b0] sm:$0xff]  ;;  %v1276_v50 = vld [vmem:[%s1603_s1 + $0x1a8] sm:$0xff]  ;;  %v1259_v52 = vld [vmem:[%s1603_s1 + $0x120] sm:$0xff] }
  0x15   :  { %605 = vmatpush.bf16.msra.mxu3 %v1251_v15  ;;  %v1285_v47 = vld [vmem:[%s1603_s1 + $0x1f0] sm:$0xff]  ;;  %v1284_v51 = vld [vmem:[%s1603_s1 + $0x1e8] sm:$0xff]  ;;  %v1267_v53 = vld [vmem:[%s1603_s1 + $0x160] sm:$0xff] }
  0x16   :  { %567 = vmatpush.bf16.msra.mxu0 %v1226_v16  ;;  %v1275_v54 = vld [vmem:[%s1603_s1 + $0x1a0] sm:$0xff]  ;;  %v1258_v56 = vld [vmem:[%s1603_s1 + $0x118] sm:$0xff]  ;;  %v1257_v60 = vld [vmem:[%s1603_s1 + $0x110] sm:$0xff] }
  0x17   :  { %580 = vmatpush.bf16.msra.mxu1 %v1234_v17  ;;  %v1283_v55 = vld [vmem:[%s1603_s1 + $0x1e0] sm:$0xff]  ;;  %v1266_v57 = vld [vmem:[%s1603_s1 + $0x158] sm:$0xff]  ;;  %v1265_v61 = vld [vmem:[%s1603_s1 + $0x150] sm:$0xff] }
  0x18   :  { %593 = vmatpush.bf16.msra.mxu2 %v1242_v18  ;;  %v1274_v58 = vld [vmem:[%s1603_s1 + $0x198] sm:$0xff]  ;;  %v1273_v62 = vld [vmem:[%s1603_s1 + $0x190] sm:$0xff]  ;;  %v1256_v0 = vld [vmem:[%s1603_s1 + $0x108] sm:$0xff] }
  0x19   :  { %606 = vmatpush.bf16.msra.mxu3 %v1250_v19  ;;  %v1282_v59 = vld [vmem:[%s1603_s1 + $0x1d8] sm:$0xff]  ;;  %v1281_v63 = vld [vmem:[%s1603_s1 + $0x1d0] sm:$0xff]  ;;  %v1264_v1 = vld [vmem:[%s1603_s1 + $0x148] sm:$0xff] }
  0x1a   :  { %568 = vmatpush.bf16.msra.mxu0 %v1225_v20  ;;  %v1272_v2 = vld [vmem:[%s1603_s1 + $0x188] sm:$0xff]  ;;  %v1255_v4 = vld [vmem:[%s1603_s1 + $0x100] sm:$0xff]  ;;  %v39_v10 = vld [vmem:[%s1602_s0 + $0x30] sm:$0xff] }
  0x1b   :  { %581 = vmatpush.bf16.msra.mxu1 %v1233_v21  ;;  %v1280_v3 = vld [vmem:[%s1603_s1 + $0x1c8] sm:$0xff]  ;;  %v1263_v5 = vld [vmem:[%s1603_s1 + $0x140] sm:$0xff]  ;;  %v40_v11 = vld [vmem:[%s1602_s0 + $0x38] sm:$0xff]  ;;  %v47_v14 = vpack.c.bf16 %v39_v10, %v39_v10 }
  0x1c   :  { %594 = vmatpush.bf16.msra.mxu2 %v1241_v22  ;;  %v1271_v6 = vld [vmem:[%s1603_s1 + $0x180] sm:$0xff]  ;;  %v38_v8 = vld [vmem:[%s1602_s0 + $0x28] sm:$0xff]  ;;  %v48_v15 = vpack.c.bf16 %v40_v11, %v40_v11 }
  0x1d   :  { %607 = vmatpush.bf16.msra.mxu3 %v1249_v23  ;;  %v37_v7 = vld [vmem:[%s1602_s0 + $0x20] sm:$0xff]  ;;  %v46_v13 = vpack.c.bf16 %v38_v8, %v38_v8 }
  0x1e   :  { %569 = vmatpush.bf16.msra.mxu0 %v1224_v24  ;;  %v1279_v9 = vld [vmem:[%s1603_s1 + $0x1c0] sm:$0xff]  ;;  %v45_v12 = vpack.c.bf16 %v37_v7, %v37_v7 }
  0x1f   :  { %582 = vmatpush.bf16.msra.mxu1 %v1232_v25 }
  0x20   :  { %595 = vmatpush.bf16.msra.mxu2 %v1240_v26  ;;  %v1342_v26 = vmov 8.0  }
  0x21   :  { %608 = vmatpush.bf16.msra.mxu3 %v1248_v27  ;;  %1307 = vrcp.f32 %v1342_v26  ;;  %v1301_v26 = vld [vmem:[#allocation2 + $0x70] sm:$0xff] }
  0x22   :  { %570 = vmatpush.bf16.msra.mxu0 %v1223_v28 }
  0x23   :  { %583 = vmatpush.bf16.msra.mxu1 %v1231_v29 }
  0x24   :  { %596 = vmatpush.bf16.msra.mxu2 %v1239_v30 }
  0x25   :  { %609 = vmatpush.bf16.msra.mxu3 %v1247_v31  ;;  %571 = vmatmul.bf16.vlgmr.msra.gmra.mxu0 %v41_v41  ;;  %v1294_v41 = vld [vmem:[#allocation2 + $0x38] sm:$0xff] }
  0x26   :  { %615 = vmatpush.bf16.msrb.mxu0 %v1262_v32  ;;  %584 = vmatmul.bf16.vlgmr.msra.gmra.mxu1 %v42_v43 }
  0x27   :  { %628 = vmatpush.bf16.msrb.mxu1 %v1270_v35  ;;  %597 = vmatmul.bf16.vlgmr.msra.gmra.mxu2 %v43_v40  ;;  %v1308_v30 = vpop.eup %1307 }
  0x28   :  { %641 = vmatpush.bf16.msrb.mxu2 %v1278_v38  ;;  %610 = vmatmul.bf16.vlgmr.msra.gmra.mxu3 %v44_v42  ;;  %v674_v32 = vmul.f32 8.0, %v1308_v30  ;;  %vm678_vm0 = vweird.f32 %v1308_v30 }
  0x29   :  { %654 = vmatpush.bf16.msrb.mxu3 %v1286_v39 }
  0x2a   :  { %616 = vmatpush.bf16.msrb.mxu0 %v1261_v44  ;;  %v675_v39 = vsub.f32 1.0, %v674_v32 }
  0x2b   :  { %629 = vmatpush.bf16.msrb.mxu1 %v1269_v45 }
  0x2c   :  { %642 = vmatpush.bf16.msrb.mxu2 %v1277_v46  ;;  %v676_v43 = vmul.f32 %v1308_v30, %v675_v39  ;;  %v1297_v39 = vld [vmem:[#allocation2 + $0x50] sm:$0xff] }
  0x2d   :  { %655 = vmatpush.bf16.msrb.mxu3 %v1285_v47  ;;  %v1293_v47 = vld [vmem:[#allocation2 + $0x30] sm:$0xff] }
  0x2e   :  { %617 = vmatpush.bf16.msrb.mxu0 %v1260_v48 }
  0x2f   :  { %630 = vmatpush.bf16.msrb.mxu1 %v1268_v49  ;;  %v677_v49 = vadd.f32 %v1308_v30, %v676_v43 }
  0x30   :  { %643 = vmatpush.bf16.msrb.mxu2 %v1276_v50 }
  0x31   :  { %656 = vmatpush.bf16.msrb.mxu3 %v1284_v51  ;;  %v1292_v51 = vld [vmem:[#allocation2 + $0x28] sm:$0xff] }
  0x32   :  { %618 = vmatpush.bf16.msrb.mxu0 %v1259_v52 }
  0x33   :  { %631 = vmatpush.bf16.msrb.mxu1 %v1267_v53  ;;  %v1587_v53 = vsel %vm678_vm0, %v1308_v30, %v677_v49  ;;  %v1300_v30 = vld [vmem:[#allocation2 + $0x68] sm:$0xff] }
  0x34   :  { %644 = vmatpush.bf16.msrb.mxu2 %v1275_v54 }
  0x35   :  { %657 = vmatpush.bf16.msrb.mxu3 %v1283_v55  ;;  %v1291_v55 = vld [vmem:[#allocation2 + $0x20] sm:$0xff] }
  0x36   :  { %619 = vmatpush.bf16.msrb.mxu0 %v1258_v56 }
  0x37   :  { %632 = vmatpush.bf16.msrb.mxu1 %v1266_v57 }
  0x38   :  { %645 = vmatpush.bf16.msrb.mxu2 %v1274_v58  ;;  %v1290_v58 = vld [vmem:[#allocation2 + $0x18] sm:$0xff] }
  0x39   :  { %658 = vmatpush.bf16.msrb.mxu3 %v1282_v59 }
  0x3a   :  { %620 = vmatpush.bf16.msrb.mxu0 %v1257_v60 }
  0x3b   :  { %633 = vmatpush.bf16.msrb.mxu1 %v1265_v61  ;;  %v1289_v61 = vld [vmem:[#allocation2 + $0x10] sm:$0xff] }
  0x3c   :  { %646 = vmatpush.bf16.msrb.mxu2 %v1273_v62 }
  0x3d   :  { %659 = vmatpush.bf16.msrb.mxu3 %v1281_v63 }
  0x3e   :  { %621 = vmatpush.bf16.msrb.mxu0 %v1256_v0  ;;  %v1288_v0 = vld [vmem:[#allocation2 + $0x8] sm:$0xff] }
  0x3f   :  { %634 = vmatpush.bf16.msrb.mxu1 %v1264_v1 }
  0x40   :  { %647 = vmatpush.bf16.msrb.mxu2 %v1272_v2  ;;  %v1287_v2 = vld [vmem:[#allocation2] sm:$0xff] }
  0x41   :  { %660 = vmatpush.bf16.msrb.mxu3 %v1280_v3 }
  0x42   :  { %622 = vmatpush.bf16.msrb.mxu0 %v1255_v4 }
  0x43   :  { %635 = vmatpush.bf16.msrb.mxu1 %v1263_v5 }
  0x44   :  { %648 = vmatpush.bf16.msrb.mxu2 %v1271_v6 }
  0x45   :  { %661 = vmatpush.bf16.msrb.mxu3 %v1279_v9  ;;  %623 = vmatmul.bf16.vlgmr.msrb.gmra.mxu0 %v45_v12  ;;  %v49_v12 = vld [vmem:[%s1605_s3] sm:$0x3] }
  0x46   :  { %636 = vmatmul.bf16.vlgmr.msrb.gmra.mxu1 %v46_v13  ;;  %772 = vmatpush.bf16.msra.mxu0 %v1294_v41 }
  0x47   :  { %649 = vmatmul.bf16.vlgmr.msrb.gmra.mxu2 %v47_v14 }
  0x48   :  { %662 = vmatmul.bf16.vlgmr.msrb.gmra.mxu3 %v48_v15 }
  0x4a   :  { %773 = vmatpush.bf16.msra.mxu0 %v1293_v47 }
  0x4e   :  { %774 = vmatpush.bf16.msra.mxu0 %v1292_v51 }
  0x52   :  { %775 = vmatpush.bf16.msra.mxu0 %v1291_v55  ;;  %v50_v55 = vld [vmem:[%s1605_s3 + $0x2] sm:$0x3] }
  0x56   :  { %776 = vmatpush.bf16.msra.mxu0 %v1290_v58 }
  0x5a   :  { %777 = vmatpush.bf16.msra.mxu0 %v1289_v61 }
  0x5e   :  { %778 = vmatpush.bf16.msra.mxu0 %v1288_v0 }
  0x62   :  { %779 = vmatpush.bf16.msra.mxu0 %v1287_v2 }
  0xa2   :  { %v572_v16 = vpop.f32.mrf.mxu0 }
  0xa3   :  { %v585_v17 = vpop.f32.mrf.mxu1 }
  0xa4   :  { %v586_v24 = vadd.f32 %v585_v17, %v572_v16  ;;  %v704_v17 = vperm.slane %v49_v12, 1 }
  0xaa   :  { %v598_v18 = vpop.f32.mrf.mxu2  ;;  %v574_v20 = vpop.f32.mrf.mxu0 }
  0xab   :  { %v611_v19 = vpop.f32.mrf.mxu3  ;;  %v587_v21 = vpop.f32.mrf.mxu1  ;;  %v599_v25 = vadd.f32 %v598_v18, %v586_v24 }
  0xad   :  { %v612_v27 = vadd.f32 %v611_v19, %v599_v25 }
  0xb2   :  { %v600_v22 = vpop.f32.mrf.mxu2 }
  0xb3   :  { %v613_v23 = vpop.f32.mrf.mxu3 }
  0xb4   :  { %v1302_v23 = vld [vmem:[#allocation2 + $0x78] sm:$0xff] }
  0xb5   :  { %884 = vmatpush.bf16.msra.mxu1 %v1302_v23 }
  0xb9   :  { %885 = vmatpush.bf16.msra.mxu1 %v1301_v26 }
  0xbd   :  { %886 = vmatpush.bf16.msra.mxu1 %v1300_v30 }
  0xc2   :  { %v624_v28 = vpop.f32.mrf.mxu0 }
  0xc3   :  { %v637_v29 = vpop.f32.mrf.mxu1  ;;  %v625_v31 = vadd.f32 %v624_v28, %v612_v27 }
  0xc5   :  { %v638_v33 = vadd.f32 %v637_v29, %v625_v31 }
  0xca   :  { %v650_v34 = vpop.f32.mrf.mxu2  ;;  %v626_v37 = vpop.f32.mrf.mxu0 }
  0xcb   :  { %v663_v35 = vpop.f32.mrf.mxu3  ;;  %v651_v36 = vadd.f32 %v650_v34, %v638_v33  ;;  %v639_v38 = vpop.f32.mrf.mxu1  ;;  %v1299_v33 = vld [vmem:[#allocation2 + $0x60] sm:$0xff] }
  0xcc   :  { %887 = vmatpush.bf16.msra.mxu1 %v1299_v33 }
  0xcd   :  { %v664_v40 = vadd.f32 %v663_v35, %v651_v36  ;;  %v1298_v36 = vld [vmem:[#allocation2 + $0x58] sm:$0xff] }
  0xcf   :  { %v667_v42 = vrot.slane %v664_v40, 4 }
  0xd0   :  { %888 = vmatpush.bf16.msra.mxu1 %v1298_v36 }
  0xd1   :  { %v668_v44 = vadd.f32 %v667_v42, %v664_v40  ;;  %v1296_v42 = vld [vmem:[#allocation2 + $0x48] sm:$0xff] }
  0xd2   :  { %v652_v45 = vpop.f32.mrf.mxu2 }
  0xd3   :  { %v665_v46 = vpop.f32.mrf.mxu3  ;;  %v669_v48 = vrot.slane %v668_v44, 2  ;;  %v1295_v45 = vld [vmem:[#allocation2 + $0x40] sm:$0xff] }
  0xd4   :  { %889 = vmatpush.bf16.msra.mxu1 %v1297_v39 }
  0xd5   :  { %v670_v50 = vadd.f32 %v669_v48, %v668_v44 }
  0xd7   :  { %v671_v52 = vrot.slane %v670_v50, 1 }
  0xd8   :  { %890 = vmatpush.bf16.msra.mxu1 %v1296_v42 }
  0xd9   :  { %v672_v54 = vadd.f32 %v671_v52, %v670_v50 }
  0xdb   :  { %v680_v56 = vmul.f32 %v1587_v53, %v672_v54 }
  0xdc   :  { %891 = vmatpush.bf16.msra.mxu1 %v1295_v45 }
  0xdd   :  { %v681_v57 = vsub.f32 %v664_v40, %v680_v56 }
  0xdf   :  { %v682_v59 = vmul.f32 %v681_v57, %v681_v57 }
  0xe1   :  { %v683_v60 = vrot.slane %v682_v59, 4 }
  0xe3   :  { %v684_v62 = vadd.f32 %v683_v60, %v682_v59  ;;  %v815_v60 = vperm.slane %v50_v55, 1 }
  0xe5   :  { %v685_v63 = vrot.slane %v684_v62, 2 }
  0xe7   :  { %v686_v1 = vadd.f32 %v685_v63, %v684_v62 }
  0xe9   :  { %v687_v3 = vrot.slane %v686_v1, 1 }
  0xeb   :  { %v688_v4 = vadd.f32 %v687_v3, %v686_v1 }
  0xed   :  { %v689_v5 = vmul.f32 %v688_v4, %v1587_v53 }
  0xef   :  { %v690_v6 = vadd.f32 1e-05, %v689_v5 }
  0xf1   :  { %1309 = vrsqrt.f32 %v690_v6  ;;  %vm697_vm2 = vweird.f32 %v690_v6 }
  0xf7   :  { %v1310_v7 = vpop.eup %1309 }
  0xf8   :  { %v692_v8 = vmul.f32 %v1310_v7, %v690_v6  ;;  %vm698_vm1 = vweird.f32 %v1310_v7 }
  0xf9   :  { %vm699_vm3 = vmor %vm697_vm2, %vm698_vm1 }
  0xfa   :  { %v693_v9 = vmul.f32 %v1310_v7, %v692_v8 }
  0xfc   :  { %v694_v10 = vmul.f32 0.5, %v693_v9 }
  0xfe   :  { %v695_v11 = vsub.f32 1.5, %v694_v10 }
 0x100   :  { %v696_v13 = vmul.f32 %v1310_v7, %v695_v11 }
 0x102   :  { %v700_v14 = vsel %vm699_vm3, %v1310_v7, %v696_v13 }
 0x103   :  { %v701_v15 = vmul.f32 %v700_v14, %v49_v12 }
 0x105   :  { %v702_v16 = vperm.slane %v701_v15, 0 }
 0x107   :  { %v703_v18 = vmul.f32 %v702_v16, %v681_v57 }
 0x109   :  { %v705_v19 = vadd.f32 %v704_v17, %v703_v18 }
 0x10b   :  { %v706_v20 = vmax.f32 %v705_v19, 0.0 }
 0x10d   :  { %v707_v21 = vpack.c.bf16 %v706_v20, %v706_v20 }
 0x10f   :  { %780 = vmatmul.bf16.vlgmr.msra.gmra.mxu0 %v707_v21 }
 0x18c   :  { %v781_v22 = vpop.f32.mrf.mxu0 }
 0x18d   :  { %v785_v24 = vrot.slane %v781_v22, 4 }
 0x18f   :  { %v786_v25 = vadd.f32 %v785_v24, %v781_v22 }
 0x191   :  { %v787_v27 = vrot.slane %v786_v25, 2 }
 0x193   :  { %v788_v28 = vadd.f32 %v787_v27, %v786_v25 }
 0x194   :  { %v783_v29 = vpop.f32.mrf.mxu0 }
 0x195   :  { %v789_v31 = vrot.slane %v788_v28, 1 }
 0x197   :  { %v790_v32 = vadd.f32 %v789_v31, %v788_v28 }
 0x199   :  { %v791_v34 = vmul.f32 %v790_v32, %v1587_v53 }
 0x19b   :  { %v792_v35 = vsub.f32 %v781_v22, %v791_v34 }
 0x19d   :  { %v793_v37 = vmul.f32 %v792_v35, %v792_v35 }
 0x19f   :  { %v794_v38 = vrot.slane %v793_v37, 4 }
 0x1a1   :  { %v795_v40 = vadd.f32 %v794_v38, %v793_v37 }
 0x1a3   :  { %v796_v41 = vrot.slane %v795_v40, 2 }
 0x1a5   :  { %v797_v43 = vadd.f32 %v796_v41, %v795_v40 }
 0x1a7   :  { %v798_v44 = vrot.slane %v797_v43, 1 }
 0x1a9   :  { %v799_v46 = vadd.f32 %v798_v44, %v797_v43 }
 0x1ab   :  { %v800_v47 = vmul.f32 %v799_v46, %v1587_v53 }
 0x1ad   :  { %v801_v48 = vadd.f32 1e-05, %v800_v47 }
 0x1af   :  { %1311 = vrsqrt.f32 %v801_v48  ;;  %vm808_vm5 = vweird.f32 %v801_v48 }
 0x1b5   :  { %v1312_v49 = vpop.eup %1311 }
 0x1b6   :  { %v803_v50 = vmul.f32 %v1312_v49, %v801_v48  ;;  %vm809_vm4 = vweird.f32 %v1312_v49 }
 0x1b7   :  { %vm810_vm6 = vmor %vm808_vm5, %vm809_vm4 }
 0x1b8   :  { %v804_v51 = vmul.f32 %v1312_v49, %v803_v50 }
 0x1ba   :  { %v805_v52 = vmul.f32 0.5, %v804_v51 }
 0x1bc   :  { %v806_v54 = vsub.f32 1.5, %v805_v52 }
 0x1be   :  { %v807_v56 = vmul.f32 %v1312_v49, %v806_v54 }
 0x1c0   :  { %v811_v57 = vsel %vm810_vm6, %v1312_v49, %v807_v56 }
 0x1c1   :  { %v812_v58 = vmul.f32 %v811_v57, %v50_v55 }
 0x1c3   :  { %v813_v59 = vperm.slane %v812_v58, 0 }
 0x1c5   :  { %v814_v53 = vmul.f32 %v813_v59, %v792_v35 }
 0x1c7   :  { %v816_v61 = vadd.f32 %v815_v60, %v814_v53 }
 0x1c9   :  { %v817_v62 = vmax.f32 %v816_v61, 0.0 }
 0x1cb   :  { %v818_v63 = vpack.c.bf16 %v817_v62, %v817_v62 }
 0x1cd   :  { %892 = vmatmul.bf16.vlgmr.msra.gmra.mxu1 %v818_v63 }
 0x24a   :  { %v893_v0 = vpop.f32.mrf.mxu1 }
 0x24b   :  { %897 = vst [vmem:[%s1606_s4] sm:$0xff] %v893_v0 }
 0x252   :  { %v895_v1 = vpop.f32.mrf.mxu1 }
 0x253   :  { %902 = vsyncpa [#allocation3], 1 }

</bundles_post_ra>
